<compile_context>
chip_gen: v6e
topology: v6e:2x2x1
jax: 0.10.0
libtpu: 0.0.40
codegen_flags: <defaults>
</compile_context>

<pallas_src>
import functools

import jax
import jax.numpy as jnp
from jax.experimental import pallas as pl
from jax.experimental.pallas import tpu as pltpu

_LANE = 128


def _round_up(a, b):
    return ((a + b - 1) // b) * b


def _vmem_capacity_bytes():
    """Per-core VMEM capacity; conservative fallback if the query fails."""
    try:
        cap = getattr(pltpu.get_tpu_info(), "vmem_capacity_bytes", None)
        if cap:
            return int(cap)
    except Exception:
        pass
    return 64 << 20  # conservative: v7x per-TensorCore size


def _rmsnorm_kernel(x_ref, w_ref, o_ref, *, eps, inv_hidden):
    # x_ref: (TM, Hp) tile of rows; w_ref: (1, Hp) f32 gain; o_ref: (TM, Hp).
    # The f32 cast is performed independently per use so the full f32 copy of
    # the tile does not need to stay live across both passes.
    xf = x_ref[...].astype(jnp.float32)
    ssq = jnp.sum(xf * xf, axis=-1, keepdims=True)        # (TM, 1) lane reduce (XLU)
    inv_rms = jax.lax.rsqrt(ssq * inv_hidden + eps)        # EUP rsqrt
    o_ref[...] = (x_ref[...].astype(jnp.float32) * inv_rms * w_ref[...]).astype(o_ref.dtype)


def rmsnorm_pallas(x, weight, eps=1e-6, *, row_tile=None, vmem_budget_bytes=None):
    """x: (..., hidden); weight: (hidden,). Returns same shape/dtype as x."""
    orig_shape = x.shape
    orig_dtype = x.dtype
    hidden = orig_shape[-1]
    assert weight.shape == (hidden,)

    x2d = x.reshape(-1, hidden)
    n_rows = x2d.shape[0]

    itemsize = jnp.dtype(orig_dtype).itemsize
    # Sublane packing: 8 rows for 32-bit, 16 for 16-bit, 32 for 8-bit dtypes.
    sublane = max(8, 32 // itemsize)

    # Lane-density guard: pad hidden to a multiple of 128 so the store path is
    # full unmasked vst. The mean still divides by the *real* hidden, and the
    # padded weight lanes are zero, so padded output lanes are zero and sliced.
    hidden_p = _round_up(hidden, _LANE)
    pad_h = hidden_p - hidden
    w_f32 = weight.astype(jnp.float32)   # matches the PyTorch f32-math path
    if pad_h:
        x2d = jnp.pad(x2d, ((0, 0), (0, pad_h)))
        w_f32 = jnp.pad(w_f32, (0, pad_h))
    w2d = w_f32.reshape(1, hidden_p)

    # ----- generation-aware budgets ------------------------------------
    vmem_cap = _vmem_capacity_bytes()
    if vmem_cap <= (64 << 20):                    # v7x: 64 MiB per TensorCore
        default_budget, default_tile = 20 << 20, 512
        limit_cap = min(int(vmem_cap * 0.72), 46 << 20)
    else:                                         # v5e / v6e: 128 MiB
        default_budget, default_tile = 44 << 20, 1024
        limit_cap = 92 << 20
    budget = default_budget if vmem_budget_bytes is None else vmem_budget_bytes
    row_tile = default_tile if row_tile is None else row_tile

    # Peak VMEM bytes per row: 2 bufs x (in + out) pipeline = 4*itemsize B/elem
    # plus ~8 B/elem of in-kernel f32 working set (cast tile + product temps).
    bytes_per_row = hidden_p * (4 * itemsize + 8)
    max_rows_by_vmem = max(sublane, budget // bytes_per_row)
    tile = min(row_tile, max_rows_by_vmem, _round_up(n_rows, sublane))
    tile = max(sublane, (tile // sublane) * sublane)
    # Keep >= 2 grid steps whenever possible so the parallel row axis can be
    # sharded across both v7x TensorCores (one extra ~0.35us step on v5e/v6e).
    if n_rows > sublane:
        tile = min(tile, _round_up(pl.cdiv(n_rows, 2), sublane))
    grid = pl.cdiv(n_rows, tile)

    pipeline_bytes = 2 * 2 * tile * hidden_p * itemsize          # in+out, 2-deep
    work_bytes = tile * hidden_p * 8 + _round_up(hidden_p * 4, 512)  # f32 temps + gain
    vmem_limit = int(min(max(pipeline_bytes + work_bytes + (8 << 20), 32 << 20),
                         limit_cap))

    # 3-deep buffering only when per-step DMAs are tiny and the grid is long
    # enough for the extra buffer to hide DMA latency.
    x_spec_kwargs = {}
    if grid >= 3 and tile * hidden_p * itemsize < (1 << 20):
        x_spec_kwargs["pipeline_mode"] = pl.Buffered(3)

    kernel = functools.partial(_rmsnorm_kernel, eps=float(eps),
                               inv_hidden=1.0 / float(hidden))

    # TODO(synk): confirm on a v7x trace that ("parallel",) shards the row grid
    # across both TensorCores; if one core does all steps, switch to a
    # CORE_PARALLEL leading axis / pl.core_map split.
    out = pl.pallas_call(
        kernel,
        out_shape=jax.ShapeDtypeStruct((n_rows, hidden_p), orig_dtype),
        grid_spec=pltpu.PrefetchScalarGridSpec(
            num_scalar_prefetch=0,
            grid=(grid,),
            in_specs=[
                pl.BlockSpec((tile, hidden_p), lambda i: (i, 0), **x_spec_kwargs),
                pl.BlockSpec((1, hidden_p), lambda i: (0, 0)),   # gain, DMA'd once
            ],
            out_specs=pl.BlockSpec((tile, hidden_p), lambda i: (i, 0)),
        ),
        compiler_params=pltpu.CompilerParams(
            dimension_semantics=("parallel",),
            vmem_limit_bytes=vmem_limit,
        ),
    )(x2d, w2d)

    if pad_h:
        out = out[:, :hidden]
    return out.reshape(orig_shape)


if __name__ == "__main__":
    key = jax.random.PRNGKey(0)

    batch, seq, hidden = 2, 8, 32
    eps = 1e-6

    x = jax.random.normal(key, (batch, seq, hidden), dtype=jnp.bfloat16)
    # Parameter init mirrors nn.Parameter(ones(hidden_size)) (f32 by default).
    weight = jnp.ones((hidden,), dtype=jnp.float32)

    y = rmsnorm_pallas(x, weight, eps)
    y = jax.block_until_ready(y)

    # Reference in plain JAX (f32 math, cast back), matching the PyTorch path.
    xf = x.astype(jnp.float32)
    ref = (xf * jax.lax.rsqrt(jnp.mean(xf * xf, axis=-1, keepdims=True) + eps)
           * weight).astype(x.dtype)

    assert y.shape == x.shape and y.dtype == x.dtype
    assert jnp.allclose(y.astype(jnp.float32), ref.astype(jnp.float32),
                        atol=1e-2, rtol=1e-2)

    print("KERNEL_OK")
</pallas_src>

<mosaic_0001>
module attributes {stable_mosaic.version = 11 : i64} {
  func.func @_rmsnorm_kernel(%arg0: i32, %arg1: memref<16x128xbf16, #tpu.memory_space<vmem>>, %arg2: memref<1x128xf32, #tpu.memory_space<vmem>>, %arg3: memref<16x128xbf16, #tpu.memory_space<vmem>>) attributes {dimension_semantics = [#tpu.dimension_semantics<parallel>], iteration_bounds = array<i64: 1>, scalar_prefetch = 0 : i64, scratch_operands = 0 : i64, tpu.core_type = #tpu.core_type<tc>, window_params = [{transform_indices = @transform_0, window_bounds = array<i64: 16, 128>}, {pipeline_mode = #tpu.pipeline_mode<synchronous>, transform_indices = @transform_1, window_bounds = array<i64: 1, 128>}, {transform_indices = @transform_2, window_bounds = array<i64: 16, 128>}]} {
    %c0 = arith.constant 0 : index
    %c0_0 = arith.constant 0 : index
    %0 = vector.load %arg1[%c0, %c0_0] : memref<16x128xbf16, #tpu.memory_space<vmem>>, vector<16x128xbf16>
    %1 = arith.extf %0 : vector<16x128xbf16> to vector<16x128xf32>
    %2 = arith.mulf %1, %1 : vector<16x128xf32>
    %cst = arith.constant dense<0.000000e+00> : vector<16xf32>
    %3 = vector.multi_reduction <add>, %2, %cst [1] : vector<16x128xf32> to vector<16xf32>
    %4 = vector.shape_cast %3 : vector<16xf32> to vector<16x1xf32>
    %cst_1 = arith.constant 3.125000e-02 : f32
    %5 = vector.broadcast %cst_1 : f32 to vector<16x1xf32>
    %6 = arith.mulf %4, %5 : vector<16x1xf32>
    %cst_2 = arith.constant 9.99999997E-7 : f32
    %7 = vector.broadcast %cst_2 : f32 to vector<16x1xf32>
    %8 = arith.addf %6, %7 : vector<16x1xf32>
    %9 = math.rsqrt %8 : vector<16x1xf32>
    %c0_3 = arith.constant 0 : index
    %c0_4 = arith.constant 0 : index
    %10 = vector.load %arg1[%c0_3, %c0_4] : memref<16x128xbf16, #tpu.memory_space<vmem>>, vector<16x128xbf16>
    %11 = arith.extf %10 : vector<16x128xbf16> to vector<16x128xf32>
    %12 = vector.broadcast %9 : vector<16x1xf32> to vector<16x128xf32>
    %13 = arith.mulf %11, %12 : vector<16x128xf32>
    %c0_5 = arith.constant 0 : index
    %c0_6 = arith.constant 0 : index
    %14 = vector.load %arg2[%c0_5, %c0_6] : memref<1x128xf32, #tpu.memory_space<vmem>>, vector<1x128xf32>
    %15 = vector.broadcast %14 : vector<1x128xf32> to vector<16x128xf32>
    %16 = arith.mulf %13, %15 : vector<16x128xf32>
    %17 = arith.truncf %16 : vector<16x128xf32> to vector<16x128xbf16>
    %c0_7 = arith.constant 0 : index
    %c0_8 = arith.constant 0 : index
    %18 = vector.load %arg3[%c0_7, %c0_8] : memref<16x128xbf16, #tpu.memory_space<vmem>>, vector<16x128xbf16>
    tpu.vector_store %arg3[%c0_7, %c0_8], %17 {strides = array<i32>} : memref<16x128xbf16, #tpu.memory_space<vmem>>, vector<16x128xbf16>,
    return
  }
  func.func @transform_0(%arg0: i32) -> (i32, i32) {
    %c0_i32 = arith.constant 0 : i32
    %c0_i32_0 = arith.constant 0 : i32
    return %arg0, %c0_i32 : i32, i32
  }
  func.func @transform_1(%arg0: i32) -> (i32, i32) {
    %c0_i32 = arith.constant 0 : i32
    %c0_i32_0 = arith.constant 0 : i32
    %c0_i32_1 = arith.constant 0 : i32
    return %c0_i32, %c0_i32_0 : i32, i32
  }
  func.func @transform_2(%arg0: i32) -> (i32, i32) {
    %c0_i32 = arith.constant 0 : i32
    %c0_i32_0 = arith.constant 0 : i32
    return %arg0, %c0_i32 : i32, i32
  }
}

</mosaic_0001>

<bundles_post_ra>
// kernel: tpu_custom_call.1
= control target key start
LH: loop header
LB: loop body
LE: loop exit
PB: predicated region body
PF: predicated region fallthrough
CT: control target
= control target key end

     0   :  { %7 = vsyncpa [#allocation3], 0  ;;  %s180_s0 = inlined_call_operand.hbm [shape: bf16[16,128], index: 0, kind: input, shape index: {}]   ;;  %s181_s1 = inlined_call_operand.vmem [shape: f32[1,128], index: 1, kind: input, shape index: {}]   ;;  %s182_s2 = inlined_call_operand.hbm [shape: bf16[16,128], index: 2, kind: output, shape index: {}]  }
   0x1   :  { %8 = vsyncpa [#allocation4], 0  ;;  %s146_s9 = smov [#allocation2]  }
   0x2   :  { %s14_s10 = sshll.u32 %s146_s9, 4  ;;  %s15_s10 = int_to_ptr.vmem [resolvable:$true] %s14_s10 }
   0x3   :  { %s110_s11 = scalar_lea.vmem %s15_s10, 128  ;;  %p115_p1 = scmp.lt.s32.totalorder %s15_s10, %s15_s10 }
   0x4   :  { %p111_p0 = scmp.ne.s32.totalorder %s15_s10, %s110_s11  ;;  %p116_p2 = scmp.lt.s32.totalorder %s110_s11, %s110_s11 }
   0x6   :  { %p117_p3 = por %p116_p2, %p115_p1 }
   0x8   :  { %p118_p4 = pnand %p117_p3, %p111_p0 }
   0xa   :  { %121 = shalt.err (!%p118_p4)
}
   0xb   :  { %s147_s12 = smov 64   ;;  %s148_s13 = smov 4  }
   0xc   :  { %20 = dma.hbm_to_vmem [thread:$0]  %s180_s0, 128, %s15_s10, [#allocation3], %s147_s12, %s147_s12, %s148_s13  }
   0xd   :  { %142 = dma.done.wait [#allocation3], 128  }
   0xe   :  { %143 = vsyncadd [#allocation3], 4294967168  ;;  %v86_v0 = vld [vmem:[#allocation2] sm:$0xff]   ;;  %s149_s17 = smov [#allocation5]  }
   0xf   :  { %v87_v1 = vunpack.c.l.bf16 %v86_v0  ;;  %v88_v2 = vunpack.c.h.bf16 %v86_v0  ;;  %v80_v14 = vld [vmem:[%s181_s1] ss:$0 sm:$0xff]  ;;  %s68_s18 = sshll.u32 %s149_s17, 4  ;;  %s69_s18 = int_to_ptr.vmem [resolvable:$true] %s68_s18 }
  0x10   :  { %s122_s19 = scalar_lea.vmem %s69_s18, 128  ;;  %p127_p6 = scmp.lt.s32.totalorder %s69_s18, %s69_s18 }
  0x11   :  { %v30_v3 = vmul.f32 %v87_v1, %v87_v1  ;;  %v31_v4 = vmul.f32 %v88_v2, %v88_v2  ;;  %p123_p5 = scmp.ne.s32.totalorder %s69_s18, %s122_s19  ;;  %p128_p7 = scmp.lt.s32.totalorder %s122_s19, %s122_s19 }
  0x13   :  { %32 = vadd.xlane.f32.xlu0 %v30_v3  ;;  %p129_p8 = por %p128_p7, %p127_p6 }
  0x15   :  { %p130_p9 = pnand %p129_p8, %p123_p5 }
  0x17   :  { %34 = vadd.xlane.f32.xlu0 %v31_v4 }
  0x9c   :  { %v33_v5 = vpop.xlane.xlu0 %32 }
  0x9d   :  { %v36_v6 = vmul.f32 0.03125, %v33_v5 }
  0x9f   :  { %v38_v7 = vadd.f32 1e-06, %v36_v6 }
  0xa0   :  { %v35_v8 = vpop.xlane.xlu0 %34 }
  0xa1   :  { %98 = vrsqrt.f32 %v38_v7  ;;  %v37_v9 = vmul.f32 0.03125, %v35_v8 }
  0xa3   :  { %v39_v10 = vadd.f32 1e-06, %v37_v9 }
  0xa5   :  { %100 = vrsqrt.f32 %v39_v10 }
  0xae   :  { %v99_v11 = vpop.eup %98 }
  0xaf   :  { %v42_v12 = vmul.f32 %v99_v11, %v87_v1 }
  0xb1   :  { %v51_v16 = vmul.f32 %v80_v14, %v42_v12 }
  0xb2   :  { %v101_v13 = vpop.eup %100 }
  0xb3   :  { %v43_v15 = vmul.f32 %v101_v13, %v88_v2 }
  0xb5   :  { %v52_v17 = vmul.f32 %v80_v14, %v43_v15 }
  0xb7   :  { %v92_v18 = vpack.c.bf16 %v52_v17, %v51_v16 }
  0xb9   :  { %93 = vst [vmem:[#allocation5] sm:$0xff] %v92_v18  }
  0xba   :  { %133 = shalt.err (!%p130_p9)
}
  0xbb   :  { %74 = dma.vmem_to_hbm [thread:$0]  %s69_s18, 128, %s182_s2, [#allocation4], %s147_s12, %s147_s12, %s148_s13  }
  0xbc   :  { %144 = dma.done.wait [#allocation4], 128  }
  0xbd   :  { %145 = vsyncadd [#allocation4], 4294967168 }
  0xbe   :  { %78 = vsyncpa [#allocation3], 1 }
  0xbf   :  { %79 = vsyncpa [#allocation4], 1 }

</bundles_post_ra>
